<compile_context>
chip_gen: v6e
topology: v6e:2x2x1
jax: 0.10.0
libtpu: 0.0.40
codegen_flags: <defaults>
</compile_context>

<pallas_src>
import functools

import jax
import jax.numpy as jnp
from jax.experimental import pallas as pl
from jax.experimental.pallas import tpu as pltpu


ALPHA = 0.1  # module default


# ----------------------------- Pallas kernels ------------------------------

def _node_linear_kernel(x_ref, w_ref, b_ref, o_ref):
    # nl = x @ W + b
    o_ref[...] = (jnp.dot(x_ref[...], w_ref[...],
                          preferred_element_type=jnp.float32) + b_ref[...])


def _fused_edge_agg_kernel(dst_ref, hs_ref, ef_ref, we_ref, be_ref, x_ref,
                           o_ref, acc_ref, *, tn, te, alpha):
    # grid = (node_blocks, edge_chunks); acc_ref is resident across edge chunks.
    j = pl.program_id(1)

    @pl.when(j == 0)
    def _():
        acc_ref[...] = jnp.zeros_like(acc_ref)

    # fused edge linear + u_mul_e message (never materialized in HBM)
    f = (jnp.dot(ef_ref[...], we_ref[...],
                 preferred_element_type=jnp.float32) + be_ref[...])
    msg = hs_ref[...] * f                                        # (te, O)

    # segment-sum over dst: build a (tn, te) one-hot in-kernel (VPU) and feed
    # the MXU; no N x E incidence matrix ever hits HBM.
    i = pl.program_id(0)
    node_ids = i * tn + jax.lax.broadcasted_iota(jnp.int32, (tn, te), 0)
    onehot = (node_ids == dst_ref[...]).astype(jnp.float32)      # dst_ref: (1, te)
    acc_ref[...] += jnp.dot(onehot, msg, preferred_element_type=jnp.float32)

    @pl.when(j == pl.num_programs(1) - 1)
    def _():
        # activation (ReLU) + residual, fused in-kernel (free VPU work)
        o_ref[...] = x_ref[...] + alpha * jnp.maximum(acc_ref[...], 0.0)


# ------------------------------ wrappers ------------------------------------

def pallas_node_linear(x, w, b, tn):
    Np, Fi = x.shape
    Fo = w.shape[1]
    return pl.pallas_call(
        _node_linear_kernel,
        out_shape=jax.ShapeDtypeStruct((Np, Fo), jnp.float32),
        grid=(Np // tn,),
        in_specs=[pl.BlockSpec((tn, Fi), lambda i: (i, 0)),
                  pl.BlockSpec((Fi, Fo), lambda i: (0, 0)),
                  pl.BlockSpec((1, Fo), lambda i: (0, 0))],
        out_specs=pl.BlockSpec((tn, Fo), lambda i: (i, 0)),
        compiler_params=pltpu.CompilerParams(dimension_semantics=("parallel",)),
    )(x, w, b.reshape(1, Fo))


def pallas_fused_edge_aggregate(dst_row, hs, ef, we, be, x_nodes, tn, te, alpha):
    Np, Fi = x_nodes.shape
    Ep, Fe = ef.shape
    O = we.shape[1]
    assert Fi == O, "residual x + alpha*h requires in_feats == out_feats"
    kernel = functools.partial(_fused_edge_agg_kernel, tn=tn, te=te, alpha=alpha)
    return pl.pallas_call(
        kernel,
        out_shape=jax.ShapeDtypeStruct((Np, O), jnp.float32),
        grid=(Np // tn, Ep // te),
        in_specs=[pl.BlockSpec((1, te), lambda i, j: (0, j)),    # dst indices (row vec)
                  pl.BlockSpec((te, O), lambda i, j: (j, 0)),    # hs = nl[src] (masked)
                  pl.BlockSpec((te, Fe), lambda i, j: (j, 0)),   # raw edge feats
                  pl.BlockSpec((Fe, O), lambda i, j: (0, 0)),    # w_edge
                  pl.BlockSpec((1, O), lambda i, j: (0, 0)),     # b_edge
                  pl.BlockSpec((tn, Fi), lambda i, j: (i, 0))],  # node_feats (residual)
        out_specs=pl.BlockSpec((tn, O), lambda i, j: (i, 0)),
        scratch_shapes=[pltpu.VMEM((tn, O), jnp.float32)],
        compiler_params=pltpu.CompilerParams(
            dimension_semantics=("parallel", "arbitrary")),
    )(dst_row, hs, ef, we, be.reshape(1, O), x_nodes)


# ------------------------- full forward (glue + kernels) --------------------

def dist_gcn_forward(params, node_feats, edge_feats, src, dst,
                     alpha=ALPHA, node_tile=128, edge_tile=128):
    N, Fi = node_feats.shape
    E = edge_feats.shape[0]
    O = params["w_node"].shape[1]
    assert Fi == O, "module residual requires in_feats == out_feats"

    if E == 0:                       # matches the module's early exit
        return node_feats

    # Tail handling: pad rows/edges to tile multiples; padded edges are masked
    # to produce zero messages, padded nodes are sliced off at the end.
    Np = pl.cdiv(N, node_tile) * node_tile
    Ep = pl.cdiv(E, edge_tile) * edge_tile
    x_p = jnp.zeros((Np, Fi), jnp.float32).at[:N].set(node_feats)
    ef_p = jnp.zeros((Ep, edge_feats.shape[1]), jnp.float32).at[:E].set(edge_feats)
    src_p = jnp.zeros((Ep,), jnp.int32).at[:E].set(src.astype(jnp.int32))
    dst_p = jnp.zeros((Ep,), jnp.int32).at[:E].set(dst.astype(jnp.int32))
    evalid = jnp.zeros((Ep, 1), jnp.float32).at[:E].set(1.0)

    # 1) node linear projection (Pallas)
    nl = pallas_node_linear(x_p, params["w_node"], params["b_node"], node_tile)

    # 2) gather per-edge source-node features (single XLA gather as glue).
    # TODO(synk): fold this gather into the fused kernel via scalar-prefetched
    # src indices / DMA gather to avoid the [Ep, O] HBM round trip.
    hs = jnp.take(nl, src_p, axis=0) * evalid    # padded edges -> zero message

    # 3) fused: edge linear + u_mul_e + segment-sum(dst) + ReLU + residual
    out_p = pallas_fused_edge_aggregate(
        dst_p.reshape(1, Ep), hs, ef_p,
        params["w_edge"], params["b_edge"], x_p,
        node_tile, edge_tile, alpha)
    return out_p[:N]


# ------------------------------ reference -----------------------------------

def dist_gcn_reference(params, node_feats, edge_feats, src, dst, alpha=ALPHA):
    hp = jax.lax.Precision.HIGHEST
    N = node_feats.shape[0]
    nl = jnp.dot(node_feats, params["w_node"], precision=hp) + params["b_node"]
    f = jnp.dot(edge_feats, params["w_edge"], precision=hp) + params["b_edge"]
    msg = nl[src] * f
    agg = jnp.zeros((N, f.shape[1]), jnp.float32).at[dst].add(msg)
    h = jnp.maximum(agg, 0.0)        # activation fixed to ReLU
    return node_feats + alpha * h


# --------------------------------- main --------------------------------------

if __name__ == "__main__":
    # in_feats must equal out_feats for the module's residual; O = 128 keeps the
    # feature axis lane-dense. N / E are deliberately NOT tile multiples.
    IN_FEATS = 128
    EDGE_FEATS = 64
    OUT_FEATS = 128
    N_NODES = 48
    N_EDGES = 200

    key = jax.random.PRNGKey(0)
    keys = jax.random.split(key, 8)

    def linear_init(kw, kb, fan_in, fan_out):
        bound = 1.0 / jnp.sqrt(jnp.float32(fan_in))
        w = jax.random.uniform(kw, (fan_in, fan_out), jnp.float32, -bound, bound)
        b = jax.random.uniform(kb, (fan_out,), jnp.float32, -bound, bound)
        return w, b

    w_node, b_node = linear_init(keys[0], keys[1], IN_FEATS, OUT_FEATS)
    w_edge, b_edge = linear_init(keys[2], keys[3], EDGE_FEATS, OUT_FEATS)
    params = dict(w_node=w_node, b_node=b_node, w_edge=w_edge, b_edge=b_edge)

    node_feats = jax.random.normal(keys[4], (N_NODES, IN_FEATS), jnp.float32)
    edge_feats = jax.random.normal(keys[5], (N_EDGES, EDGE_FEATS), jnp.float32)

    # deterministic graph topology
    src = (jnp.arange(N_EDGES, dtype=jnp.int32) * 7) % N_NODES
    dst = (jnp.arange(N_EDGES, dtype=jnp.int32) * 3 + 1) % N_NODES

    out = dist_gcn_forward(params, node_feats, edge_feats, src, dst)
    out = jax.block_until_ready(out)

    ref = dist_gcn_reference(params, node_feats, edge_feats, src, dst)
    assert out.shape == (N_NODES, OUT_FEATS)
    assert jnp.allclose(out, ref, rtol=1e-2, atol=1e-2), "mismatch vs reference"

    print("KERNEL_OK")
</pallas_src>

<mosaic_0001>
module attributes {stable_mosaic.version = 11 : i64} {
  func.func @_node_linear_kernel(%arg0: i32, %arg1: memref<128x128xf32, #tpu.memory_space<vmem>>, %arg2: memref<128x128xf32, #tpu.memory_space<vmem>>, %arg3: memref<1x128xf32, #tpu.memory_space<vmem>>, %arg4: memref<128x128xf32, #tpu.memory_space<vmem>>) attributes {dimension_semantics = [#tpu.dimension_semantics<parallel>], iteration_bounds = array<i64: 1>, scalar_prefetch = 0 : i64, scratch_operands = 0 : i64, tpu.core_type = #tpu.core_type<tc>, window_params = [{transform_indices = @transform_0, window_bounds = array<i64: 128, 128>}, {pipeline_mode = #tpu.pipeline_mode<synchronous>, transform_indices = @transform_1, window_bounds = array<i64: 128, 128>}, {pipeline_mode = #tpu.pipeline_mode<synchronous>, transform_indices = @transform_2, window_bounds = array<i64: 1, 128>}, {transform_indices = @transform_3, window_bounds = array<i64: 128, 128>}]} {
    %c0 = arith.constant 0 : index
    %c0_0 = arith.constant 0 : index
    %0 = vector.load %arg1[%c0, %c0_0] : memref<128x128xf32, #tpu.memory_space<vmem>>, vector<128x128xf32>
    %c0_1 = arith.constant 0 : index
    %c0_2 = arith.constant 0 : index
    %1 = vector.load %arg2[%c0_1, %c0_2] : memref<128x128xf32, #tpu.memory_space<vmem>>, vector<128x128xf32>
    %cst = arith.constant dense<0.000000e+00> : vector<128x128xf32>
    %2 = tpu.matmul %0, %1, %cst {dimension_numbers = #tpu.dot_dimension_numbers<[1], [0], [0], [1], [0, 0, 1, 1], [], []>} : vector<128x128xf32>, vector<128x128xf32>, vector<128x128xf32> -> vector<128x128xf32>
    %c0_3 = arith.constant 0 : index
    %c0_4 = arith.constant 0 : index
    %3 = vector.load %arg3[%c0_3, %c0_4] : memref<1x128xf32, #tpu.memory_space<vmem>>, vector<1x128xf32>
    %4 = vector.broadcast %3 : vector<1x128xf32> to vector<128x128xf32>
    %5 = arith.addf %2, %4 : vector<128x128xf32>
    %c0_5 = arith.constant 0 : index
    %c0_6 = arith.constant 0 : index
    %6 = vector.load %arg4[%c0_5, %c0_6] : memref<128x128xf32, #tpu.memory_space<vmem>>, vector<128x128xf32>
    tpu.vector_store %arg4[%c0_5, %c0_6], %5 {strides = array<i32>} : memref<128x128xf32, #tpu.memory_space<vmem>>, vector<128x128xf32>,
    return
  }
  func.func @transform_0(%arg0: i32) -> (i32, i32) {
    %c0_i32 = arith.constant 0 : i32
    %c0_i32_0 = arith.constant 0 : i32
    return %arg0, %c0_i32 : i32, i32
  }
  func.func @transform_1(%arg0: i32) -> (i32, i32) {
    %c0_i32 = arith.constant 0 : i32
    %c0_i32_0 = arith.constant 0 : i32
    %c0_i32_1 = arith.constant 0 : i32
    return %c0_i32, %c0_i32_0 : i32, i32
  }
  func.func @transform_2(%arg0: i32) -> (i32, i32) {
    %c0_i32 = arith.constant 0 : i32
    %c0_i32_0 = arith.constant 0 : i32
    %c0_i32_1 = arith.constant 0 : i32
    return %c0_i32, %c0_i32_0 : i32, i32
  }
  func.func @transform_3(%arg0: i32) -> (i32, i32) {
    %c0_i32 = arith.constant 0 : i32
    %c0_i32_0 = arith.constant 0 : i32
    return %arg0, %c0_i32 : i32, i32
  }
}

</mosaic_0001>

<bundles_post_ra>
// kernel: tpu_custom_call.1
= control target key start
LH: loop header
LB: loop body
LE: loop exit
PB: predicated region body
PF: predicated region fallthrough
CT: control target
= control target key end

     0   :  { %8 = vsyncpa [#allocation3], 0  ;;  %s499_s0 = inlined_call_operand.hbm [shape: f32[128,128], index: 0, kind: input, shape index: {}]   ;;  %s500_s1 = inlined_call_operand.hbm [shape: f32[128,128], index: 1, kind: input, shape index: {}]   ;;  %s501_s2 = inlined_call_operand.vmem [shape: f32[1,128], index: 2, kind: input, shape index: {}]   ;;  %s502_s3 = inlined_call_operand.hbm [shape: f32[128,128], index: 3, kind: output, shape index: {}]  }
   0x1   :  { %9 = vsyncpa [#allocation6], 0 }
   0x2   :  { %10 = vsyncpa [#allocation4], 0  ;;  %s453_s12 = smov [#allocation2]  }
   0x3   :  { %s16_s13 = sshll.u32 %s453_s12, 4  ;;  %s17_s13 = int_to_ptr.vmem [resolvable:$true] %s16_s13 }
   0x4   :  { %s395_s14 = scalar_lea.vmem %s17_s13, 2048  ;;  %p400_p1 = scmp.lt.s32.totalorder %s17_s13, %s17_s13 }
   0x5   :  { %p396_p0 = scmp.ne.s32.totalorder %s17_s13, %s395_s14  ;;  %p401_p2 = scmp.lt.s32.totalorder %s395_s14, %s395_s14 }
   0x7   :  { %p402_p3 = por %p401_p2, %p400_p1 }
   0x9   :  { %p403_p4 = pnand %p402_p3, %p396_p0 }
   0xb   :  { %406 = shalt.err (!%p403_p4)
}
   0xc   :  { %s454_s15 = smov 128   ;;  %s455_s16 = smov 8  }
   0xd   :  { %22 = dma.hbm_to_vmem [thread:$0]  %s499_s0, 2048, %s17_s13, [#allocation3], %s454_s15, %s454_s15, %s455_s16  }
   0xe   :  { %s456_s19 = smov [#allocation5]  }
   0xf   :  { %s28_s20 = sshll.u32 %s456_s19, 4  ;;  %s29_s20 = int_to_ptr.vmem [resolvable:$true] %s28_s20 }
  0x10   :  { %s415_s21 = scalar_lea.vmem %s29_s20, 2048  ;;  %p420_p6 = scmp.lt.s32.totalorder %s29_s20, %s29_s20 }
  0x11   :  { %p416_p5 = scmp.ne.s32.totalorder %s29_s20, %s415_s21  ;;  %p421_p7 = scmp.lt.s32.totalorder %s415_s21, %s415_s21 }
  0x13   :  { %p422_p8 = por %p421_p7, %p420_p6 }
  0x15   :  { %p423_p9 = pnand %p422_p8, %p416_p5 }
  0x17   :  { %426 = shalt.err (!%p423_p9)
}
  0x18   :  { %34 = dma.hbm_to_vmem [thread:$0]  %s500_s1, 2048, %s29_s20, [#allocation6], %s454_s15, %s454_s15, %s455_s16  }
  0x19   :  { %447 = dma.done.wait [#allocation3], 2048  }
  0x1a   :  { %448 = vsyncadd [#allocation3], 4294965248 }
  0x1b   :  { %449 = dma.done.wait [#allocation6], 2048  }
  0x1c   :  { %450 = vsyncadd [#allocation6], 4294965248  ;;  %v74_v0 = vld [vmem:[#allocation5 + $0x78] sm:$0xff]  ;;  %v73_v1 = vld [vmem:[#allocation5 + $0x70] sm:$0xff] }
  0x1d   :  { %294 = vmatprep.subr.mxu0 %v74_v0  ;;  %350 = vmatprep.subr.mxu1 %v74_v0  ;;  %v72_v2 = vld [vmem:[#allocation5 + $0x68] sm:$0xff]  ;;  %v71_v3 = vld [vmem:[#allocation5 + $0x60] sm:$0xff]  ;;  %v70_v4 = vld [vmem:[#allocation5 + $0x58] sm:$0xff] }
  0x1e   :  { %295 = vmatpush3.msra.mxu0 %v74_v0  ;;  %366 = vmatpush3.msra.mxu1 %v74_v0  ;;  %v69_v5 = vld [vmem:[#allocation5 + $0x50] sm:$0xff]  ;;  %v68_v6 = vld [vmem:[#allocation5 + $0x48] sm:$0xff]  ;;  %v67_v7 = vld [vmem:[#allocation5 + $0x40] sm:$0xff] }
  0x1f   :  { %296 = vmatprep.subr.mxu0 %v73_v1  ;;  %351 = vmatprep.subr.mxu1 %v73_v1  ;;  %v66_v8 = vld [vmem:[#allocation5 + $0x38] sm:$0xff]  ;;  %v65_v9 = vld [vmem:[#allocation5 + $0x30] sm:$0xff]  ;;  %v64_v10 = vld [vmem:[#allocation5 + $0x28] sm:$0xff] }
  0x20   :  { %297 = vmatpush3.msra.mxu0 %v73_v1  ;;  %367 = vmatpush3.msra.mxu1 %v73_v1  ;;  %v63_v11 = vld [vmem:[#allocation5 + $0x20] sm:$0xff]  ;;  %v62_v12 = vld [vmem:[#allocation5 + $0x18] sm:$0xff]  ;;  %v61_v13 = vld [vmem:[#allocation5 + $0x10] sm:$0xff] }
  0x21   :  { %298 = vmatprep.subr.mxu0 %v72_v2  ;;  %352 = vmatprep.subr.mxu1 %v72_v2  ;;  %v60_v14 = vld [vmem:[#allocation5 + $0x8] sm:$0xff]  ;;  %v59_v15 = vld [vmem:[#allocation5] sm:$0xff]  ;;  %v45_v20 = vld [vmem:[#allocation2 + $0x10] sm:$0xff] }
  0x22   :  { %299 = vmatpush3.msra.mxu0 %v72_v2  ;;  %368 = vmatpush3.msra.mxu1 %v72_v2  ;;  %v43_v16 = vld [vmem:[#allocation2] sm:$0xff]  ;;  %v44_v18 = vld [vmem:[#allocation2 + $0x8] sm:$0xff]  ;;  %v53_v21 = vld [vmem:[#allocation2 + $0x50] sm:$0xff] }
  0x23   :  { %300 = vmatprep.subr.mxu0 %v71_v3  ;;  %353 = vmatprep.subr.mxu1 %v71_v3  ;;  %v51_v17 = vld [vmem:[#allocation2 + $0x40] sm:$0xff]  ;;  %v52_v19 = vld [vmem:[#allocation2 + $0x48] sm:$0xff]  ;;  %v46_v22 = vld [vmem:[#allocation2 + $0x18] sm:$0xff] }
  0x24   :  { %301 = vmatpush3.msra.mxu0 %v71_v3  ;;  %369 = vmatpush3.msra.mxu1 %v71_v3  ;;  %v54_v23 = vld [vmem:[#allocation2 + $0x58] sm:$0xff]  ;;  %v47_v24 = vld [vmem:[#allocation2 + $0x20] sm:$0xff]  ;;  %v48_v26 = vld [vmem:[#allocation2 + $0x28] sm:$0xff] }
  0x25   :  { %302 = vmatprep.subr.mxu0 %v70_v4  ;;  %354 = vmatprep.subr.mxu1 %v70_v4  ;;  %v55_v25 = vld [vmem:[#allocation2 + $0x60] sm:$0xff]  ;;  %v56_v27 = vld [vmem:[#allocation2 + $0x68] sm:$0xff]  ;;  %v49_v28 = vld [vmem:[#allocation2 + $0x30] sm:$0xff] }
  0x26   :  { %303 = vmatpush3.msra.mxu0 %v70_v4  ;;  %370 = vmatpush3.msra.mxu1 %v70_v4  ;;  %v57_v29 = vld [vmem:[#allocation2 + $0x70] sm:$0xff]  ;;  %v50_v30 = vld [vmem:[#allocation2 + $0x38] sm:$0xff]  ;;  %v261_v32 = vld [vmem:[%s501_s2] ss:$0 sm:$0xff]  ;;  %s457_s2 = smov [#allocation7]  }
  0x27   :  { %304 = vmatprep.subr.mxu0 %v69_v5  ;;  %355 = vmatprep.subr.mxu1 %v69_v5  ;;  %v58_v31 = vld [vmem:[#allocation2 + $0x78] sm:$0xff]  ;;  %s248_s24 = sshll.u32 %s457_s2, 4  ;;  %s249_s24 = int_to_ptr.vmem [resolvable:$true] %s248_s24 }
  0x28   :  { %305 = vmatpush3.msra.mxu0 %v69_v5  ;;  %371 = vmatpush3.msra.mxu1 %v69_v5  ;;  %s427_s25 = scalar_lea.vmem %s249_s24, 2048  ;;  %p432_p11 = scmp.lt.s32.totalorder %s249_s24, %s249_s24 }
  0x29   :  { %306 = vmatprep.subr.mxu0 %v68_v6  ;;  %356 = vmatprep.subr.mxu1 %v68_v6  ;;  %p428_p10 = scmp.ne.s32.totalorder %s249_s24, %s427_s25  ;;  %p433_p12 = scmp.lt.s32.totalorder %s427_s25, %s427_s25 }
  0x2a   :  { %307 = vmatpush3.msra.mxu0 %v68_v6  ;;  %372 = vmatpush3.msra.mxu1 %v68_v6 }
  0x2b   :  { %308 = vmatprep.subr.mxu0 %v67_v7  ;;  %357 = vmatprep.subr.mxu1 %v67_v7  ;;  %p434_p13 = por %p433_p12, %p432_p11 }
  0x2c   :  { %309 = vmatpush3.msra.mxu0 %v67_v7  ;;  %373 = vmatpush3.msra.mxu1 %v67_v7 }
  0x2d   :  { %310 = vmatprep.subr.mxu0 %v66_v8  ;;  %358 = vmatprep.subr.mxu1 %v66_v8  ;;  %p435_p0 = pnand %p434_p13, %p428_p10 }
  0x2e   :  { %311 = vmatpush3.msra.mxu0 %v66_v8  ;;  %374 = vmatpush3.msra.mxu1 %v66_v8 }
  0x2f   :  { %312 = vmatprep.subr.mxu0 %v65_v9  ;;  %359 = vmatprep.subr.mxu1 %v65_v9 }
  0x30   :  { %313 = vmatpush3.msra.mxu0 %v65_v9  ;;  %375 = vmatpush3.msra.mxu1 %v65_v9 }
  0x31   :  { %314 = vmatprep.subr.mxu0 %v64_v10  ;;  %360 = vmatprep.subr.mxu1 %v64_v10 }
  0x32   :  { %315 = vmatpush3.msra.mxu0 %v64_v10  ;;  %376 = vmatpush3.msra.mxu1 %v64_v10 }
  0x33   :  { %316 = vmatprep.subr.mxu0 %v63_v11  ;;  %361 = vmatprep.subr.mxu1 %v63_v11 }
  0x34   :  { %317 = vmatpush3.msra.mxu0 %v63_v11  ;;  %377 = vmatpush3.msra.mxu1 %v63_v11 }
  0x35   :  { %318 = vmatprep.subr.mxu0 %v62_v12  ;;  %362 = vmatprep.subr.mxu1 %v62_v12 }
  0x36   :  { %319 = vmatpush3.msra.mxu0 %v62_v12  ;;  %378 = vmatpush3.msra.mxu1 %v62_v12 }
  0x37   :  { %320 = vmatprep.subr.mxu0 %v61_v13  ;;  %363 = vmatprep.subr.mxu1 %v61_v13 }
  0x38   :  { %321 = vmatpush3.msra.mxu0 %v61_v13  ;;  %379 = vmatpush3.msra.mxu1 %v61_v13 }
  0x39   :  { %322 = vmatprep.subr.mxu0 %v60_v14  ;;  %364 = vmatprep.subr.mxu1 %v60_v14 }
  0x3a   :  { %323 = vmatpush3.msra.mxu0 %v60_v14  ;;  %380 = vmatpush3.msra.mxu1 %v60_v14 }
  0x3b   :  { %324 = vmatprep.subr.mxu0 %v59_v15  ;;  %365 = vmatprep.subr.mxu1 %v59_v15 }
  0x3c   :  { %325 = vmatpush3.msra.mxu0 %v59_v15  ;;  %381 = vmatpush3.msra.mxu1 %v59_v15 }
  0x3d   :  { %326 = vmatprep.mubr.f32.mxu0 %v43_v16  ;;  %338 = vmatprep.mubr.f32.mxu1 %v51_v17 }
  0x3e   :  { %327 = vmatmul.mubr.f32.vlgmr.msra.gmra.mxu0 %v44_v18  ;;  %339 = vmatmul.mubr.f32.vlgmr.msra.gmra.mxu1 %v52_v19 }
  0x3f   :  { %329 = vmatprep.mubr.f32.mxu0 %v45_v20  ;;  %341 = vmatprep.mubr.f32.mxu1 %v53_v21 }
  0x42   :  { %330 = vmatmul.mubr.f32.gmra.mxu0 %v46_v22  ;;  %342 = vmatmul.mubr.f32.gmra.mxu1 %v54_v23 }
  0x43   :  { %332 = vmatprep.mubr.f32.mxu0 %v47_v24  ;;  %344 = vmatprep.mubr.f32.mxu1 %v55_v25 }
  0x46   :  { %333 = vmatmul.mubr.f32.gmra.mxu0 %v48_v26  ;;  %345 = vmatmul.mubr.f32.gmra.mxu1 %v56_v27 }
  0x47   :  { %335 = vmatprep.mubr.f32.mxu0 %v49_v28  ;;  %347 = vmatprep.mubr.f32.mxu1 %v57_v29 }
  0x4a   :  { %336 = vmatmul.mubr.f32.gmra.mxu0 %v50_v30  ;;  %348 = vmatmul.mubr.f32.gmra.mxu1 %v58_v31 }
  0xfe   :  { %v328_v33 = vpop.f32.mrf.mxu0  ;;  %v340_v34 = vpop.f32.mrf.mxu1 }
  0xff   :  { %v154_v35 = vadd.f32 %v328_v33, %v261_v32  ;;  %v194_v36 = vadd.f32 %v340_v34, %v261_v32 }
 0x100   :  { %v148_v37 = vpop.f32.mrf.mxu0  ;;  %v188_v38 = vpop.f32.mrf.mxu1 }
 0x101   :  { %228 = vst [vmem:[#allocation7 + $0x8] sm:$0xff] %v154_v35  ;;  %236 = vst [vmem:[#allocation7 + $0x48] sm:$0xff] %v194_v36  ;;  %v149_v39 = vadd.f32 %v261_v32, %v148_v37  ;;  %v189_v40 = vadd.f32 %v261_v32, %v188_v38 }
 0x102   :  { %v331_v41 = vpop.f32.mrf.mxu0  ;;  %v343_v42 = vpop.f32.mrf.mxu1 }
 0x103   :  { %227 = vst [vmem:[#allocation7] sm:$0xff] %v149_v39  ;;  %235 = vst [vmem:[#allocation7 + $0x40] sm:$0xff] %v189_v40  ;;  %v164_v43 = vadd.f32 %v331_v41, %v261_v32  ;;  %v204_v44 = vadd.f32 %v343_v42, %v261_v32 }
 0x104   :  { %v158_v45 = vpop.f32.mrf.mxu0  ;;  %v198_v46 = vpop.f32.mrf.mxu1 }
 0x105   :  { %230 = vst [vmem:[#allocation7 + $0x18] sm:$0xff] %v164_v43  ;;  %238 = vst [vmem:[#allocation7 + $0x58] sm:$0xff] %v204_v44  ;;  %v159_v47 = vadd.f32 %v261_v32, %v158_v45  ;;  %v199_v48 = vadd.f32 %v261_v32, %v198_v46 }
 0x106   :  { %v334_v49 = vpop.f32.mrf.mxu0  ;;  %v346_v50 = vpop.f32.mrf.mxu1 }
 0x107   :  { %229 = vst [vmem:[#allocation7 + $0x10] sm:$0xff] %v159_v47  ;;  %237 = vst [vmem:[#allocation7 + $0x50] sm:$0xff] %v199_v48  ;;  %v174_v51 = vadd.f32 %v334_v49, %v261_v32  ;;  %v214_v52 = vadd.f32 %v346_v50, %v261_v32 }
 0x108   :  { %v168_v53 = vpop.f32.mrf.mxu0  ;;  %v208_v54 = vpop.f32.mrf.mxu1 }
 0x109   :  { %232 = vst [vmem:[#allocation7 + $0x28] sm:$0xff] %v174_v51  ;;  %240 = vst [vmem:[#allocation7 + $0x68] sm:$0xff] %v214_v52  ;;  %v169_v55 = vadd.f32 %v261_v32, %v168_v53  ;;  %v209_v56 = vadd.f32 %v261_v32, %v208_v54 }
 0x10a   :  { %v337_v57 = vpop.f32.mrf.mxu0  ;;  %v349_v58 = vpop.f32.mrf.mxu1 }
 0x10b   :  { %231 = vst [vmem:[#allocation7 + $0x20] sm:$0xff] %v169_v55  ;;  %239 = vst [vmem:[#allocation7 + $0x60] sm:$0xff] %v209_v56  ;;  %v184_v59 = vadd.f32 %v337_v57, %v261_v32  ;;  %v224_v60 = vadd.f32 %v349_v58, %v261_v32 }
 0x10c   :  { %v178_v61 = vpop.f32.mrf.mxu0  ;;  %v218_v62 = vpop.f32.mrf.mxu1 }
 0x10d   :  { %234 = vst [vmem:[#allocation7 + $0x38] sm:$0xff] %v184_v59  ;;  %242 = vst [vmem:[#allocation7 + $0x78] sm:$0xff] %v224_v60  ;;  %v179_v63 = vadd.f32 %v261_v32, %v178_v61  ;;  %v219_v0 = vadd.f32 %v261_v32, %v218_v62 }
 0x10f   :  { %233 = vst [vmem:[#allocation7 + $0x30] sm:$0xff] %v179_v63  ;;  %241 = vst [vmem:[#allocation7 + $0x70] sm:$0xff] %v219_v0 }
 0x110   :  { %438 = shalt.err (!%p435_p0)
}
 0x111   :  { %254 = dma.vmem_to_hbm [thread:$0]  %s249_s24, 2048, %s502_s3, [#allocation4], %s454_s15, %s454_s15, %s455_s16  }
 0x112   :  { %451 = dma.done.wait [#allocation4], 2048  }
 0x113   :  { %452 = vsyncadd [#allocation4], 4294965248 }
 0x114   :  { %258 = vsyncpa [#allocation3], 1 }
 0x115   :  { %259 = vsyncpa [#allocation6], 1 }
 0x116   :  { %260 = vsyncpa [#allocation4], 1 }

</bundles_post_ra>
